<compile_context>
chip_gen: v7x
topology: tpu7x:2x2x1
jax: 0.10.0
libtpu: 0.0.40
codegen_flags: <defaults>
</compile_context>

<pallas_src>
import jax
import jax.numpy as jnp
from jax import lax
from jax.experimental import pallas as pl
from jax.experimental.pallas import tpu as pltpu

SMOOTH = 1.0
LANES = 128
SUBLANES = 8
NUM_CORES = 2                 # v7x megacore split; plain serial loop on 1-TC chips
TARGET_BLOCK_BYTES = 4 << 20  # ~4 MiB per input block per pipeline stage


def _round_up(x, m):
    return ((x + m - 1) // m) * m


def _sublane_granule(dtype):
    # Packed-dtype native tiles: (8,128) f32, (16,128) bf16, (32,128) int8/fp8.
    itemsize = jnp.dtype(dtype).itemsize
    return SUBLANES * max(1, 4 // max(itemsize, 1))


def _make_dice_kernel(rows_total, tile_rows, tiles_per_core,
                      first_masked_tile, need_mask):
    """Kernel with static row count / tile split baked in."""
    groups = tile_rows // SUBLANES

    def accumulate(acc_ref, x, t):
        # Lane/sublane-parallel partial sums: fold the row axis onto an
        # (8, 128) vreg tile with pure cross-vreg VPU adds.
        xr = x.reshape(groups, SUBLANES, LANES)
        tr = t.reshape(groups, SUBLANES, LANES)
        acc_ref[0] += jnp.sum(tr * xr, axis=0)
        acc_ref[1] += jnp.sum(tr, axis=0)
        acc_ref[2] += jnp.sum(xr, axis=0)

    def kernel(x_ref, t_ref, o_ref, acc_ref):
        c = pl.program_id(0)   # core split (parallel)
        i = pl.program_id(1)   # row tiles handled by this core (arbitrary)

        @pl.when(i == 0)
        def _():
            acc_ref[...] = jnp.zeros_like(acc_ref)

        x = x_ref[...].astype(jnp.float32)
        t = t_ref[...].astype(jnp.float32)

        if need_mask:
            gidx = c * tiles_per_core + i  # global (unclamped) tile index

            @pl.when(gidx < first_masked_tile)
            def _():  # steady state: no mask cost
                accumulate(acc_ref, x, t)

            @pl.when(gidx >= first_masked_tile)
            def _():  # partial last tile and/or fully-masked ghost tiles
                row_ids = lax.broadcasted_iota(jnp.int32, (tile_rows, LANES), 0)
                valid = row_ids < (rows_total - gidx * tile_rows)
                # jnp.where (not mask-multiply) so OOB garbage/NaN can't leak.
                accumulate(acc_ref,
                           jnp.where(valid, x, 0.0),
                           jnp.where(valid, t, 0.0))
        else:
            accumulate(acc_ref, x, t)

        @pl.when(i == pl.num_programs(1) - 1)
        def _():
            # Emit the per-core (3, 8, 128) partial-sum slab; the cheap
            # cross-lane reduce + SMOOTH combine happens in the wrapper.
            o_ref[...] = acc_ref[...][None]

    return kernel


def dice_loss(inp, target):
    """Pallas implementation of DiceLoss.forward(input, target)."""
    assert inp.shape == target.shape

    x_flat = jnp.ravel(inp)      # native dtype; no f32 upcast in HBM
    t_flat = jnp.ravel(target)
    n = x_flat.shape[0]

    # Ragged tail (<128 elements): pure-JAX correction, NOT a full-array pad.
    rem = n % LANES
    main = n - rem
    rows = main // LANES

    def combine(s_tx, s_t, s_x):
        if rem:
            xt = x_flat[main:].astype(jnp.float32)
            tt = t_flat[main:].astype(jnp.float32)
            s_tx = s_tx + jnp.sum(tt * xt)
            s_t = s_t + jnp.sum(tt)
            s_x = s_x + jnp.sum(xt)
        intersection = 2.0 * s_tx + SMOOTH
        union = s_t + s_x + SMOOTH
        return 1.0 - intersection / union

    if rows == 0:
        # Fewer than 128 elements total: nothing for the kernel to do.
        z = jnp.float32(0.0)
        return combine(z, z, z)

    x2 = x_flat[:main].reshape(rows, LANES)
    t2 = t_flat[:main].reshape(rows, LANES)

    granule = max(_sublane_granule(x2.dtype), _sublane_granule(t2.dtype))
    itemsize = max(jnp.dtype(x2.dtype).itemsize, jnp.dtype(t2.dtype).itemsize)
    tile_rows_max = max(
        granule, (TARGET_BLOCK_BYTES // (LANES * itemsize)) // granule * granule)
    tile_rows = min(tile_rows_max, _round_up(rows, granule))

    num_tiles = pl.cdiv(rows, tile_rows)
    tiles_per_core = pl.cdiv(num_tiles, NUM_CORES)
    total_tiles = NUM_CORES * tiles_per_core
    # First global tile index that needs row masking (partial real tile and/or
    # ghost tiles created by the 2-way core split).
    first_masked_tile = num_tiles - 1 if (rows % tile_rows) else num_tiles
    need_mask = first_masked_tile < total_tiles

    def in_index_map(c, i):
        # Clamp ghost tiles onto the last real tile (their contribution is
        # fully masked to zero in-kernel) so the DMA never reads out of range.
        return (jnp.minimum(c * tiles_per_core + i, num_tiles - 1), 0)

    kernel = _make_dice_kernel(rows, tile_rows, tiles_per_core,
                               first_masked_tile, need_mask)

    partials = pl.pallas_call(
        kernel,
        out_shape=jax.ShapeDtypeStruct((NUM_CORES, 3, SUBLANES, LANES),
                                       jnp.float32),
        grid=(NUM_CORES, tiles_per_core),
        in_specs=[
            pl.BlockSpec((tile_rows, LANES), in_index_map),
            pl.BlockSpec((tile_rows, LANES), in_index_map),
        ],
        out_specs=pl.BlockSpec((1, 3, SUBLANES, LANES),
                               lambda c, i: (c, 0, 0, 0)),
        scratch_shapes=[pltpu.VMEM((3, SUBLANES, LANES), jnp.float32)],
        compiler_params=pltpu.CompilerParams(
            dimension_semantics=("parallel", "arbitrary"),
            vmem_limit_bytes=32 * 1024 * 1024,
        ),
    )(x2, t2)

    sums = jnp.sum(partials, axis=(0, 2, 3))  # (3,) = [sum(t*x), sum(t), sum(x)]
    return combine(sums[0], sums[1], sums[2])


def dice_loss_ref(inp, target):
    """Pure-JAX reference matching the PyTorch module."""
    inp = inp.astype(jnp.float32)
    target = target.astype(jnp.float32)
    intersection = 2.0 * jnp.sum(target * inp) + SMOOTH
    union = jnp.sum(target) + jnp.sum(inp) + SMOOTH
    return 1.0 - intersection / union


if __name__ == "__main__":
    key = jax.random.PRNGKey(0)
    k1, k2 = jax.random.split(key)

    # Small NCHW-shaped prediction/target, as a segmentation loss would see.
    B, C, H, W = 2, 4, 16, 16
    inp = jax.nn.sigmoid(jax.random.normal(k1, (B, C, H, W), dtype=jnp.float32))
    target = (jax.random.uniform(k2, (B, C, H, W)) > 0.5).astype(jnp.float32)

    loss = dice_loss(inp, target)
    jax.block_until_ready(loss)

    ref = dice_loss_ref(inp, target)
    assert jnp.allclose(loss, ref, atol=1e-5, rtol=1e-5), (loss, ref)

    print("KERNEL_OK")
</pallas_src>

<mosaic_0001>
module attributes {stable_mosaic.version = 11 : i64} {
  func.func @kernel(%arg0: i32, %arg1: i32, %arg2: memref<16x128xf32, #tpu.memory_space<vmem>>, %arg3: memref<16x128xf32, #tpu.memory_space<vmem>>, %arg4: memref<1x3x8x128xf32, #tpu.memory_space<vmem>>, %arg5: memref<3x8x128xf32, #tpu.memory_space<vmem>>) attributes {dimension_semantics = [#tpu.dimension_semantics<parallel>, #tpu.dimension_semantics<arbitrary>], iteration_bounds = array<i64: 2, 1>, scalar_prefetch = 0 : i64, scratch_operands = 1 : i64, tpu.core_type = #tpu.core_type<tc>, window_params = [{transform_indices = @transform_0, window_bounds = array<i64: 16, 128>}, {transform_indices = @transform_1, window_bounds = array<i64: 16, 128>}, {transform_indices = @transform_2, window_bounds = array<i64: 1, 3, 8, 128>}]} {
    %c0_i32 = arith.constant 0 : i32
    %0 = arith.cmpi eq, %arg1, %c0_i32 : i32
    %1 = arith.extui %0 : i1 to i32
    %c0_i32_0 = arith.constant 0 : i32
    %2 = arith.cmpi ne, %1, %c0_i32_0 : i32
    scf.if %2 {
      %cst = arith.constant 0.000000e+00 : f32
      %16 = vector.broadcast %cst : f32 to vector<3x8x128xf32>
      %c0_10 = arith.constant 0 : index
      %c0_11 = arith.constant 0 : index
      %c0_12 = arith.constant 0 : index
      %17 = vector.load %arg5[%c0_10, %c0_11, %c0_12] : memref<3x8x128xf32, #tpu.memory_space<vmem>>, vector<3x8x128xf32>
      tpu.vector_store %arg5[%c0_10, %c0_11, %c0_12], %16 {strides = array<i32>} : memref<3x8x128xf32, #tpu.memory_space<vmem>>, vector<3x8x128xf32>,
    } else {
    }
    %c0 = arith.constant 0 : index
    %c0_1 = arith.constant 0 : index
    %3 = vector.load %arg2[%c0, %c0_1] : memref<16x128xf32, #tpu.memory_space<vmem>>, vector<16x128xf32>
    %c0_2 = arith.constant 0 : index
    %c0_3 = arith.constant 0 : index
    %4 = vector.load %arg3[%c0_2, %c0_3] : memref<16x128xf32, #tpu.memory_space<vmem>>, vector<16x128xf32>
    %c1_i32 = arith.constant 1 : i32
    %5 = arith.muli %arg0, %c1_i32 : i32
    %6 = arith.addi %5, %arg1 : i32
    %c1_i32_4 = arith.constant 1 : i32
    %7 = arith.cmpi slt, %6, %c1_i32_4 : i32
    %8 = arith.extui %7 : i1 to i32
    %c0_i32_5 = arith.constant 0 : i32
    %9 = arith.cmpi ne, %8, %c0_i32_5 : i32
    scf.if %9 {
      %16 = vector.shape_cast %3 : vector<16x128xf32> to vector<2x8x128xf32>
      %17 = vector.shape_cast %4 : vector<16x128xf32> to vector<2x8x128xf32>
      %c0_10 = arith.constant 0 : index
      %c0_11 = arith.constant 0 : index
      %c0_12 = arith.constant 0 : index
      %18 = vector.load %arg5[%c0_10, %c0_11, %c0_12] : memref<3x8x128xf32, #tpu.memory_space<vmem>>, vector<1x8x128xf32>
      %19 = vector.shape_cast %18 : vector<1x8x128xf32> to vector<8x128xf32>
      %20 = arith.mulf %17, %16 : vector<2x8x128xf32>
      %cst = arith.constant dense<0.000000e+00> : vector<8x128xf32>
      %21 = vector.multi_reduction <add>, %20, %cst [0] : vector<2x8x128xf32> to vector<8x128xf32>
      %22 = arith.addf %19, %21 : vector<8x128xf32>
      %c0_13 = arith.constant 0 : index
      %c0_14 = arith.constant 0 : index
      %c0_15 = arith.constant 0 : index
      %23 = vector.load %arg5[%c0_13, %c0_14, %c0_15] : memref<3x8x128xf32, #tpu.memory_space<vmem>>, vector<1x8x128xf32>
      %24 = vector.shape_cast %23 : vector<1x8x128xf32> to vector<8x128xf32>
      %25 = vector.shape_cast %22 : vector<8x128xf32> to vector<1x8x128xf32>
      tpu.vector_store %arg5[%c0_13, %c0_14, %c0_15], %25 {strides = array<i32>} : memref<3x8x128xf32, #tpu.memory_space<vmem>>, vector<1x8x128xf32>,
      %c1 = arith.constant 1 : index
      %c0_16 = arith.constant 0 : index
      %c0_17 = arith.constant 0 : index
      %26 = vector.load %arg5[%c1, %c0_16, %c0_17] : memref<3x8x128xf32, #tpu.memory_space<vmem>>, vector<1x8x128xf32>
      %27 = vector.shape_cast %26 : vector<1x8x128xf32> to vector<8x128xf32>
      %cst_18 = arith.constant dense<0.000000e+00> : vector<8x128xf32>
      %28 = vector.multi_reduction <add>, %17, %cst_18 [0] : vector<2x8x128xf32> to vector<8x128xf32>
      %29 = arith.addf %27, %28 : vector<8x128xf32>
      %c1_19 = arith.constant 1 : index
      %c0_20 = arith.constant 0 : index
      %c0_21 = arith.constant 0 : index
      %30 = vector.load %arg5[%c1_19, %c0_20, %c0_21] : memref<3x8x128xf32, #tpu.memory_space<vmem>>, vector<1x8x128xf32>
      %31 = vector.shape_cast %30 : vector<1x8x128xf32> to vector<8x128xf32>
      %32 = vector.shape_cast %29 : vector<8x128xf32> to vector<1x8x128xf32>
      tpu.vector_store %arg5[%c1_19, %c0_20, %c0_21], %32 {strides = array<i32>} : memref<3x8x128xf32, #tpu.memory_space<vmem>>, vector<1x8x128xf32>,
      %c2 = arith.constant 2 : index
      %c0_22 = arith.constant 0 : index
      %c0_23 = arith.constant 0 : index
      %33 = vector.load %arg5[%c2, %c0_22, %c0_23] : memref<3x8x128xf32, #tpu.memory_space<vmem>>, vector<1x8x128xf32>
      %34 = vector.shape_cast %33 : vector<1x8x128xf32> to vector<8x128xf32>
      %cst_24 = arith.constant dense<0.000000e+00> : vector<8x128xf32>
      %35 = vector.multi_reduction <add>, %16, %cst_24 [0] : vector<2x8x128xf32> to vector<8x128xf32>
      %36 = arith.addf %34, %35 : vector<8x128xf32>
      %c2_25 = arith.constant 2 : index
      %c0_26 = arith.constant 0 : index
      %c0_27 = arith.constant 0 : index
      %37 = vector.load %arg5[%c2_25, %c0_26, %c0_27] : memref<3x8x128xf32, #tpu.memory_space<vmem>>, vector<1x8x128xf32>
      %38 = vector.shape_cast %37 : vector<1x8x128xf32> to vector<8x128xf32>
      %39 = vector.shape_cast %36 : vector<8x128xf32> to vector<1x8x128xf32>
      tpu.vector_store %arg5[%c2_25, %c0_26, %c0_27], %39 {strides = array<i32>} : memref<3x8x128xf32, #tpu.memory_space<vmem>>, vector<1x8x128xf32>,
    } else {
    }
    %c1_i32_6 = arith.constant 1 : i32
    %10 = arith.cmpi sge, %6, %c1_i32_6 : i32
    %11 = arith.extui %10 : i1 to i32
    %c0_i32_7 = arith.constant 0 : i32
    %12 = arith.cmpi ne, %11, %c0_i32_7 : i32
    scf.if %12 {
      %16 = tpu.iota {dimensions = array<i32: 0>} : vector<16x128xi32>
      %c16_i32 = arith.constant 16 : i32
      %17 = arith.muli %6, %c16_i32 : i32
      %c16_i32_10 = arith.constant 16 : i32
      %18 = arith.subi %c16_i32_10, %17 : i32
      %19 = vector.broadcast %18 : i32 to vector<16x128xi32>
      %20 = arith.cmpi slt, %16, %19 : vector<16x128xi32>
      %cst = arith.constant 0.000000e+00 : f32
      %21 = vector.broadcast %cst : f32 to vector<16x128xf32>
      %22 = arith.select %20, %3, %21 : vector<16x128xi1>, vector<16x128xf32>
      %cst_11 = arith.constant 0.000000e+00 : f32
      %23 = vector.broadcast %cst_11 : f32 to vector<16x128xf32>
      %24 = arith.select %20, %4, %23 : vector<16x128xi1>, vector<16x128xf32>
      %25 = vector.shape_cast %22 : vector<16x128xf32> to vector<2x8x128xf32>
      %26 = vector.shape_cast %24 : vector<16x128xf32> to vector<2x8x128xf32>
      %c0_12 = arith.constant 0 : index
      %c0_13 = arith.constant 0 : index
      %c0_14 = arith.constant 0 : index
      %27 = vector.load %arg5[%c0_12, %c0_13, %c0_14] : memref<3x8x128xf32, #tpu.memory_space<vmem>>, vector<1x8x128xf32>
      %28 = vector.shape_cast %27 : vector<1x8x128xf32> to vector<8x128xf32>
      %29 = arith.mulf %26, %25 : vector<2x8x128xf32>
      %cst_15 = arith.constant dense<0.000000e+00> : vector<8x128xf32>
      %30 = vector.multi_reduction <add>, %29, %cst_15 [0] : vector<2x8x128xf32> to vector<8x128xf32>
      %31 = arith.addf %28, %30 : vector<8x128xf32>
      %c0_16 = arith.constant 0 : index
      %c0_17 = arith.constant 0 : index
      %c0_18 = arith.constant 0 : index
      %32 = vector.load %arg5[%c0_16, %c0_17, %c0_18] : memref<3x8x128xf32, #tpu.memory_space<vmem>>, vector<1x8x128xf32>
      %33 = vector.shape_cast %32 : vector<1x8x128xf32> to vector<8x128xf32>
      %34 = vector.shape_cast %31 : vector<8x128xf32> to vector<1x8x128xf32>
      tpu.vector_store %arg5[%c0_16, %c0_17, %c0_18], %34 {strides = array<i32>} : memref<3x8x128xf32, #tpu.memory_space<vmem>>, vector<1x8x128xf32>,
      %c1 = arith.constant 1 : index
      %c0_19 = arith.constant 0 : index
      %c0_20 = arith.constant 0 : index
      %35 = vector.load %arg5[%c1, %c0_19, %c0_20] : memref<3x8x128xf32, #tpu.memory_space<vmem>>, vector<1x8x128xf32>
      %36 = vector.shape_cast %35 : vector<1x8x128xf32> to vector<8x128xf32>
      %cst_21 = arith.constant dense<0.000000e+00> : vector<8x128xf32>
      %37 = vector.multi_reduction <add>, %26, %cst_21 [0] : vector<2x8x128xf32> to vector<8x128xf32>
      %38 = arith.addf %36, %37 : vector<8x128xf32>
      %c1_22 = arith.constant 1 : index
      %c0_23 = arith.constant 0 : index
      %c0_24 = arith.constant 0 : index
      %39 = vector.load %arg5[%c1_22, %c0_23, %c0_24] : memref<3x8x128xf32, #tpu.memory_space<vmem>>, vector<1x8x128xf32>
      %40 = vector.shape_cast %39 : vector<1x8x128xf32> to vector<8x128xf32>
      %41 = vector.shape_cast %38 : vector<8x128xf32> to vector<1x8x128xf32>
      tpu.vector_store %arg5[%c1_22, %c0_23, %c0_24], %41 {strides = array<i32>} : memref<3x8x128xf32, #tpu.memory_space<vmem>>, vector<1x8x128xf32>,
      %c2 = arith.constant 2 : index
      %c0_25 = arith.constant 0 : index
      %c0_26 = arith.constant 0 : index
      %42 = vector.load %arg5[%c2, %c0_25, %c0_26] : memref<3x8x128xf32, #tpu.memory_space<vmem>>, vector<1x8x128xf32>
      %43 = vector.shape_cast %42 : vector<1x8x128xf32> to vector<8x128xf32>
      %cst_27 = arith.constant dense<0.000000e+00> : vector<8x128xf32>
      %44 = vector.multi_reduction <add>, %25, %cst_27 [0] : vector<2x8x128xf32> to vector<8x128xf32>
      %45 = arith.addf %43, %44 : vector<8x128xf32>
      %c2_28 = arith.constant 2 : index
      %c0_29 = arith.constant 0 : index
      %c0_30 = arith.constant 0 : index
      %46 = vector.load %arg5[%c2_28, %c0_29, %c0_30] : memref<3x8x128xf32, #tpu.memory_space<vmem>>, vector<1x8x128xf32>
      %47 = vector.shape_cast %46 : vector<1x8x128xf32> to vector<8x128xf32>
      %48 = vector.shape_cast %45 : vector<8x128xf32> to vector<1x8x128xf32>
      tpu.vector_store %arg5[%c2_28, %c0_29, %c0_30], %48 {strides = array<i32>} : memref<3x8x128xf32, #tpu.memory_space<vmem>>, vector<1x8x128xf32>,
    } else {
    }
    %c0_i32_8 = arith.constant 0 : i32
    %13 = arith.cmpi eq, %arg1, %c0_i32_8 : i32
    %14 = arith.extui %13 : i1 to i32
    %c0_i32_9 = arith.constant 0 : i32
    %15 = arith.cmpi ne, %14, %c0_i32_9 : i32
    scf.if %15 {
      %c0_10 = arith.constant 0 : index
      %c0_11 = arith.constant 0 : index
      %c0_12 = arith.constant 0 : index
      %16 = vector.load %arg5[%c0_10, %c0_11, %c0_12] : memref<3x8x128xf32, #tpu.memory_space<vmem>>, vector<3x8x128xf32>
      %17 = vector.shape_cast %16 : vector<3x8x128xf32> to vector<1x3x8x128xf32>
      %c0_13 = arith.constant 0 : index
      %c0_14 = arith.constant 0 : index
      %c0_15 = arith.constant 0 : index
      %c0_16 = arith.constant 0 : index
      %18 = vector.load %arg4[%c0_13, %c0_14, %c0_15, %c0_16] : memref<1x3x8x128xf32, #tpu.memory_space<vmem>>, vector<1x3x8x128xf32>
      tpu.vector_store %arg4[%c0_13, %c0_14, %c0_15, %c0_16], %17 {strides = array<i32>} : memref<1x3x8x128xf32, #tpu.memory_space<vmem>>, vector<1x3x8x128xf32>,
    } else {
    }
    return
  }
  func.func @transform_0(%arg0: i32, %arg1: i32) -> (i32, i32) {
    %c1_i32 = arith.constant 1 : i32
    %0 = arith.muli %arg0, %c1_i32 : i32
    %1 = arith.addi %0, %arg1 : i32
    %c0_i32 = arith.constant 0 : i32
    %2 = arith.minsi %1, %c0_i32 : i32
    %c0_i32_0 = arith.constant 0 : i32
    %c0_i32_1 = arith.constant 0 : i32
    return %2, %c0_i32_0 : i32, i32
  }
  func.func @transform_1(%arg0: i32, %arg1: i32) -> (i32, i32) {
    %c1_i32 = arith.constant 1 : i32
    %0 = arith.muli %arg0, %c1_i32 : i32
    %1 = arith.addi %0, %arg1 : i32
    %c0_i32 = arith.constant 0 : i32
    %2 = arith.minsi %1, %c0_i32 : i32
    %c0_i32_0 = arith.constant 0 : i32
    %c0_i32_1 = arith.constant 0 : i32
    return %2, %c0_i32_0 : i32, i32
  }
  func.func @transform_2(%arg0: i32, %arg1: i32) -> (i32, i32, i32, i32) {
    %c0_i32 = arith.constant 0 : i32
    %c0_i32_0 = arith.constant 0 : i32
    %c0_i32_1 = arith.constant 0 : i32
    %c0_i32_2 = arith.constant 0 : i32
    return %arg0, %c0_i32, %c0_i32_0, %c0_i32_1 : i32, i32, i32, i32
  }
}

</mosaic_0001>

<bundles_post_ra>
// kernel: tpu_custom_call.1
= control target key start
LH: loop header
LB: loop body
LE: loop exit
PB: predicated region body
PF: predicated region fallthrough
CT: control target
= control target key end

     0   :  { %7 = vsyncpa [#allocation4], 0  ;;  %s961_s0 = inlined_call_operand.hbm [shape: f32[16,128], index: 0, kind: input, shape index: {}]   ;;  %s962_s1 = inlined_call_operand.hbm [shape: f32[16,128], index: 1, kind: input, shape index: {}]   ;;  %s963_s2 = inlined_call_operand.hbm [shape: f32[2,3,8,128], index: 2, kind: output, shape index: {}]  }
   0x1   :  { %9 = vsyncpa [#allocation4 + $0x1], 0 }
   0x2   :  { %10 = vsyncpa [#allocation7], 0 }
   0x3   :  { %12 = vsyncpa [#allocation7 + $0x1], 0 }
   0x4   :  { %13 = vsyncpa [#allocation5], 0 }
   0x5   :  { %15 = vsyncpa [#allocation5 + $0x1], 0  ;;  %s742_s9 = smov 0   ;;  %s744_s10 = smov 0  }
   0x6   :  { %s746_s11 = smov 0   ;;  %s748_s12 = smov 0  }
   0x7   :  { %s750_s13 = smov 0   ;;  %s752_s14 = smov 0  }
   0x8   :  { %s754_s15 = smov 0   ;;  %s756_s16 = smov 0  }
   0x9 LB: > { %s431_s17 = sadd.s32 4294967295, %s717_s16   ;;  %s432_s18 = sadd.s32 4294967294, %s717_s16   ;;  %s717_s16 = sphi %s756_s16, %s21_s16   ;;  %s713_s15 = sphi %s754_s15, %s982_s15   ;;  %s709_s14 = sphi %s752_s14, %s981_s14   ;;  %s705_s13 = sphi %s750_s13, %s951_s13   ;;  %s701_s12 = sphi %s748_s12, %s980_s12   ;;  %s697_s11 = sphi %s746_s11, %s979_s11   ;;  %s693_s10 = sphi %s744_s10, %s978_s10   ;;  %s689_s9 = sphi %s742_s9, %s977_s9  }
   0xa   : > { %s33_s19 = sadd.s32 1, %s713_s15  ;;  %p686_p1 = scmp.ne.s32.totalorder %s705_s13, 0 }
   0xb   : > { %p35_p0 = scmp.ge.s32.totalorder %s33_s19, 2  ;;  %p54_p2 = scmp.eq.s32.totalorder %s717_s16, 0 }
   0xc   : > { %p59_p3 = scmp.ne.s32.totalorder %s705_s13, %s701_s12  ;;  %p60_p5 = scmp.eq.s32.totalorder %s431_s17, 0 }
   0xd   : > { %s984_s19 = smov (%p35_p0, %s33_s19), 0  ;;  %p788_p4 = por %p686_p1, %p54_p2 }
   0xe   : > { %p792_p6 = por %p60_p5, %p59_p3  ;;  %s101_s22 = ssub.s32 %s713_s15, %s984_s19 }
   0xf   : > { %p102_p7 = scmp.eq.s32.totalorder %s101_s22, 0  ;;  %s104_s23 = sadd.s32 1, %s697_s11 }
  0x10   : > { %s967_s21 = scalar_select %p792_p6, 1, 0 }
  0x11   : > { %s800_s24 = scalar_select %p102_p7, %s697_s11, %s104_s23  }
  0x12   : > { %p114_p8 = scmp.ne.s32.totalorder %s697_s11, %s693_s10  ;;  %p115_p9 = scmp.eq.s32.totalorder %s431_s17, 1 }
  0x13   : > { %p120_p10 = scmp.ne.s32.totalorder %s693_s10, %s689_s9  ;;  %p121_p11 = scmp.eq.s32.totalorder %s432_s18, 1 }
  0x14   : > { %p806_p12 = por %p115_p9, %p114_p8  ;;  %p471_p1 = scmp.lt.s32.totalorder %s717_s16, 2 }
  0x15   : > { %p811_p0 = por %p121_p11, %p120_p10  ;;  %s719_s27 = smov [#allocation3]  }
  0x16   : > { %s968_s25 = scalar_select %p806_p12, 1, 0 }
  0x17   : > { %s969_s26 = scalar_select %p811_p0, 1, 0 }
  0x18   : > { %s155_s28 = sshll.u32 %s719_s27, 4  ;;  %p818_p2 = pnand %p471_p1, %p788_p4  ;;  %s156_s28 = int_to_ptr.vmem [resolvable:$true] %s155_s28 }
  0x19   : > { %s550_s4 = scalar_lea.hbm %s961_s0, 256 }
  0x1a   : > { %p551_p3 = scmp.ne.s32.totalorder %s961_s0, %s550_s4  ;;  %p552_p5 = pneg %p818_p2 }
  0x1b   : > { %p557_p8 = scmp.lt.u32.totalorder %s550_s4, %s550_s4  ;;  %p559_p9 = scmp.lt.u32.totalorder %s550_s4, %s961_s0 }
  0x1c   : > { %p553_p7 = pnand %p552_p5, %p551_p3 }
  0x1d   : > { %p560_p10 = por %p559_p9, %p557_p8 }
  0x1e   : > { %p554_p4 = pneg %p553_p7 }
  0x20   : > { %p561_p11 = pnand %p560_p10, %p554_p4 }
  0x22   : > { %564 = shalt.err (!%p561_p11)
}
  0x23   : > { %s565_s12 = scalar_lea.vmem %s156_s28, 256  ;;  %s572_s17 = scalar_lea.vmem %s156_s28, 512 }
  0x24   : > { %p566_p1 = scmp.ne.s32.totalorder %s156_s28, %s565_s12  ;;  %p573_p12 = scmp.lt.s32.totalorder %s156_s28, %s156_s28 }
  0x25   : > { %p574_p6 = scmp.lt.s32.totalorder %s572_s17, %s565_s12 }
  0x26   : > { %p568_p13 = pnand %p566_p1, %p552_p5 }
  0x27   : > { %p575_p3 = por %p574_p6, %p573_p12 }
  0x28   : > { %p569_p0 = pneg %p568_p13 }
  0x2a   : > { %p576_p7 = pnand %p575_p3, %p569_p0 }
  0x2c   : > { %579 = shalt.err (!%p576_p7)
}
  0x2d   : > { %s720_s18 = smov 128   ;;  %s721_s20 = smov 8  }
  0x2e   : > { %463 = dma.hbm_to_vmem [thread:$0]  (!%p818_p2), %s961_s0, 256, %s156_s28, [#allocation4], %s720_s18, %s720_s18, %s721_s20  }
  0x2f   : > { %p441_p13 = scmp.ge.s32.totalorder %s717_s16, 1  ;;  %p187_p4 = scmp.lt.s32.totalorder %s717_s16, 3 }
  0x30   : > { %s722_s30 = smov [#allocation6]   ;;  %s580_s6 = scalar_lea.hbm %s962_s1, 256 }
  0x31   : > { %p849_p8 = pnand %p441_p13, %p187_p4  ;;  %s179_s3 = sshll.u32 %s722_s30, 4  ;;  %s180_s3 = int_to_ptr.vmem [resolvable:$true] %s179_s3 }
  0x32   : > { %p581_p6 = scmp.ne.s32.totalorder %s962_s1, %s580_s6  ;;  %p587_p9 = scmp.lt.u32.totalorder %s580_s6, %s580_s6 }
  0x33   : > { %s971_s27 = scalar_select %p849_p8, 1, 0 }
  0x34   : > { %p583_p12 = pnand %p581_p6, %p552_p5  ;;  %p589_p10 = scmp.lt.u32.totalorder %s580_s6, %s962_s1 }
  0x36   : > { %p584_p0 = pneg %p583_p12  ;;  %p590_p11 = por %p589_p10, %p587_p9 }
  0x38   : > { %p591_p1 = pnand %p590_p11, %p584_p0 }
  0x3a   : > { %594 = shalt.err (!%p591_p1)
}
  0x3b   : > { %s595_s17 = scalar_lea.vmem %s180_s3, 256  ;;  %s602_s22 = scalar_lea.vmem %s180_s3, 512 }
  0x3c   : > { %p596_p3 = scmp.ne.s32.totalorder %s180_s3, %s595_s17  ;;  %p603_p4 = scmp.lt.s32.totalorder %s180_s3, %s180_s3 }
  0x3d   : > { %p604_p8 = scmp.lt.s32.totalorder %s602_s22, %s595_s17 }
  0x3e   : > { %p598_p7 = pnand %p596_p3, %p552_p5 }
  0x3f   : > { %p605_p6 = por %p604_p8, %p603_p4 }
  0x40   : > { %p599_p13 = pneg %p598_p7 }
  0x42   : > { %p606_p12 = pnand %p605_p6, %p599_p13 }
  0x44   : > { %609 = shalt.err (!%p606_p12)
}
  0x45   : > { %466 = dma.hbm_to_vmem [thread:$0]  (!%p818_p2), %s962_s1, 256, %s180_s3, [#allocation7], %s720_s18, %s720_s18, %s721_s20  }
  0x46   : > { %p972_p0 = scmp.ne.s32.totalorder %s971_s27, 0 }
  0x47   : > { %s193_s4 = sand.u32 (!%p972_p0), 1, %s705_s13   ;;  %p973_p5 = scmp.ne.s32.totalorder (!%p972_p0), %s967_s21, 0 }
  0x48   : > { %191 = sbr.rel (%p972_p0) target bundleno = 137 (0x89), region = 28  ;;  %s442_s5 = sshll.u32 (!%p972_p0), %s193_s4, 4 }
  0x49   : > { %s194_s6 = scalar_lea.sflag (!%p972_p0), [#allocation4], %s193_s4  ;;  %s197_s7 = scalar_lea.vmem (!%p972_p0), [#allocation3], %s442_s5 }
  0x4f   : > { %675 = dma.done.wait (%p973_p5), %s194_s6, 256  }
  0x50   : > { %677 = vsyncadd (%p973_p5), %s194_s6, 4294967040  ;;  %s203_s29 = scalar_lea.sflag [#allocation7], %s193_s4  ;;  %s206_s8 = scalar_lea.vmem [#allocation6], %s442_s5 }
  0x51   : > { %679 = dma.done.wait (%p973_p5), %s203_s29, 256  }
  0x52   : > { %681 = vsyncadd (%p973_p5), %s203_s29, 4294967040  ;;  %s229_s18 = sand.u32 1, %s693_s10   ;;  %v723_v0 = vmov 0.0   ;;  %v247_v1 = vld [vmem:[%s197_s7] sm:$0xff]  ;;  %v248_v2 = vld [vmem:[%s197_s7 + $0x8] sm:$0xff]  ;;  %p444_p2 = scmp.ge.s32.totalorder %s709_s14, 1 }
  0x53   : > { %s452_s20 = smul.u32 24, %s229_s18  ;;  %244 = vst [vmem:[#allocation2] sm:$0xff] %v723_v0  ;;  %245 = vst [vmem:[#allocation2 + $0x8] sm:$0xff] %v723_v0  ;;  %v249_v3 = vld [vmem:[%s206_s8] sm:$0xff]  ;;  %v250_v4 = vld [vmem:[%s206_s8 + $0x8] sm:$0xff]  ;;  %v269_v10 = vadd.f32 (!%p444_p2), %v248_v2, %v247_v1 }
  0x54   : > { %246 = vst [vmem:[#allocation2 + $0x10] sm:$0xff] %v723_v0  ;;  %255 = sbr.rel (%p444_p2) target bundleno = 95 (0x5f), region = 44  ;;  %v257_v5 = vmul.f32 (!%p444_p2), %v249_v3, %v247_v1  ;;  %v258_v6 = vmul.f32 (!%p444_p2), %v250_v4, %v248_v2  ;;  %v264_v8 = vadd.f32 (!%p444_p2), %v250_v4, %v249_v3 }
  0x55   : > { %s890_s27 = scalar_lea.vmem [#allocation8], %s452_s20 }
  0x56   : > { %v259_v12 = vadd.f32 (!%p444_p2), %v258_v6, %v257_v5 }
  0x5a   : > { %v263_v7 = vld [vmem:[#allocation2 + $0x8] sm:$0xff] (!%p444_p2)  ;;  %v256_v11 = vld [vmem:[#allocation2] sm:$0xff] (!%p444_p2) }
  0x5b   : > { %v268_v9 = vld [vmem:[#allocation2 + $0x10] sm:$0xff]  ;;  %v265_v13 = vadd.f32 %v264_v8, %v263_v7  ;;  %v260_v15 = vadd.f32 %v259_v12, %v256_v11 }
  0x5c   : > { %v270_v14 = vadd.f32 %v269_v10, %v268_v9 }
  0x5d   : > { %266 = vst [vmem:[#allocation2 + $0x8] sm:$0xff] %v265_v13  ;;  %261 = vst [vmem:[#allocation2] sm:$0xff] %v260_v15 }
  0x5e   : > { %271 = vst [vmem:[#allocation2 + $0x10] sm:$0xff] %v270_v14 }
  0x5f PF: > { %p445_p8 = scmp.lt.s32.totalorder %s709_s14, 1 }
  0x60   : > { %v276_v16 = vlaneseq (!%p445_p8)  ;;  %s446_s21 = sshll.u32 (!%p445_p8), %s709_s14, 4 }
  0x61   : > { %275 = sbr.rel (%p445_p8) target bundleno = 111 (0x6f), region = 48  ;;  %s280_s3 = ssub.s32 (!%p445_p8), 16, %s446_s21 }
  0x62   : > { %v277_v17 = vshrl.u32 (!%p445_p8), %v276_v16, 7  ;;  %v281_v18 = vstv (!%p445_p8), %s280_s3 }
  0x64   : > { %v278_v19 = vadd.s32 (!%p445_p8), 8, %v277_v17  ;;  %vm282_vm0 = vcmp.lt.s32.totalorder (!%p445_p8), %v277_v17, %v281_v18  ;;  %v295_v25 = vld [vmem:[#allocation2 + $0x8] sm:$0xff] (!%p445_p8)  ;;  %v288_v30 = vld [vmem:[#allocation2] sm:$0xff] (!%p445_p8) }
  0x65   : > { %v284_v20 = vsel (!%p445_p8), %vm282_vm0, %v247_v1, 0.0  ;;  %v286_v21 = vsel (!%p445_p8), %vm282_vm0, %v249_v3, 0.0  ;;  %v300_v26 = vld [vmem:[#allocation2 + $0x10] sm:$0xff] (!%p445_p8) }
  0x66   : > { %vm283_vm1 = vcmp.lt.s32.totalorder (!%p445_p8), %v278_v19, %v281_v18  ;;  %v289_v22 = vmul.f32 (!%p445_p8), %v286_v21, %v284_v20 }
  0x67   : > { %v285_v23 = vsel (!%p445_p8), %vm283_vm1, %v248_v2, 0.0  ;;  %v287_v24 = vsel (!%p445_p8), %vm283_vm1, %v250_v4, 0.0 }
  0x68   : > { %v290_v27 = vmul.f32 %v287_v24, %v285_v23  ;;  %v296_v28 = vadd.f32 %v287_v24, %v286_v21  ;;  %v301_v29 = vadd.f32 %v285_v23, %v284_v20 }
  0x6a   : > { %v291_v31 = vadd.f32 %v290_v27, %v289_v22  ;;  %v297_v32 = vadd.f32 %v296_v28, %v295_v25  ;;  %v302_v33 = vadd.f32 %v301_v29, %v300_v26 }
  0x6c   : > { %v292_v34 = vadd.f32 %v291_v31, %v288_v30  ;;  %298 = vst [vmem:[#allocation2 + $0x8] sm:$0xff] %v297_v32  ;;  %303 = vst [vmem:[#allocation2 + $0x10] sm:$0xff] %v302_v33 }
  0x6e   : > { %293 = vst [vmem:[#allocation2] sm:$0xff] %v292_v34 }
  0x6f PF: > { %s453_s28 = smul.u32 384, %s709_s14  ;;  %s327_s12 = sshll.u32 %s890_s27, 4  ;;  %s905_s12 = int_to_ptr.vmem [resolvable:$true] %s327_s12 }
  0x70   : > { %s909_s30 = scalar_lea.sflag [#allocation5], %s229_s18  ;;  %s610_s4 = scalar_lea.vmem %s905_s12, 384 }
  0x71   : > { %s903_s23 = scalar_lea.hbm %s963_s2, %s453_s28  ;;  %p611_p9 = scmp.ne.s32.totalorder %s905_s12, %s610_s4 }
  0x72   : > { %p974_p10 = scmp.ne.s32.totalorder %s968_s25, 0  ;;  %s724_s14 = smov [#allocation8]  }
  0x73   : > { %v308_v36 = vld [vmem:[#allocation2 + $0x8] sm:$0xff]  ;;  %v309_v37 = vld [vmem:[#allocation2 + $0x10] sm:$0xff]  ;;  %s614_s5 = sshll.u32 %s724_s14, 4  ;;  %s615_s5 = int_to_ptr.vmem [resolvable:$false] %s614_s5 }
  0x74   : > { %311 = vst [vmem:[%s890_s27 + $0x8] sm:$0xff] %v308_v36  ;;  %312 = vst [vmem:[%s890_s27 + $0x10] sm:$0xff] %v309_v37  ;;  %p612_p11 = pnand %p611_p9, %p974_p10  ;;  %s616_s6 = scalar_lea.vmem %s615_s5, 768 }
  0x75   : > { %v307_v35 = vld [vmem:[#allocation2] sm:$0xff]  ;;  %p617_p3 = scmp.lt.s32.totalorder %s905_s12, %s615_s5  ;;  %p618_p7 = scmp.lt.s32.totalorder %s616_s6, %s610_s4 }
  0x76   : > { %310 = vst [vmem:[%s890_s27] sm:$0xff] %v307_v35  ;;  %p613_p1 = pneg %p612_p11 }
  0x77   : > { %p619_p13 = por %p618_p7, %p617_p3 }
  0x79   : > { %p620_p4 = pnand %p619_p13, %p613_p1 }
  0x7b   : > { %623 = shalt.err (!%p620_p4)
}
  0x7c   : > { %s624_s7 = scalar_lea.hbm %s903_s23, 384  ;;  %s628_s18 = scalar_lea.hbm %s963_s2, 768 }
  0x7d   : > { %p625_p6 = scmp.ne.s32.totalorder %s903_s23, %s624_s7  ;;  %p629_p5 = scmp.lt.u32.totalorder %s903_s23, %s963_s2 }
  0x7e   : > { %p630_p2 = scmp.lt.u32.totalorder %s628_s18, %s624_s7  ;;  %p632_p9 = scmp.lt.u32.totalorder %s624_s7, %s903_s23 }
  0x7f   : > { %p626_p12 = pnand %p625_p6, %p974_p10 }
  0x80   : > { %p631_p8 = por %p630_p2, %p629_p5 }
  0x81   : > { %p627_p0 = pneg %p626_p12 }
  0x82   : > { %p633_p11 = por %p632_p9, %p631_p8 }
  0x84   : > { %p634_p1 = pnand %p633_p11, %p627_p0 }
  0x86   : > { %637 = shalt.err (!%p634_p1)
}
  0x87   : > { %s725_s21 = smov 128   ;;  %s726_s3 = smov 8  }
  0x88   : > { %458 = dma.vmem_to_hbm [thread:$0]  (%p974_p10), %s905_s12, 384, %s903_s23, %s909_s30, %s725_s21, %s725_s21, %s726_s3  }
  0x89 PF: > { %s342_s28 = sand.u32 1, %s689_s9   ;;  %p975_p3 = scmp.ne.s32.totalorder %s969_s26, 0 }
  0x8a   : > { %p976_p7 = scmp.ge.s32.totalorder %s717_s16, 2  ;;  %s343_s17 = scalar_lea.sflag [#allocation5], %s342_s28 }
  0x8c   : > { %p468_p13 = pnand %p976_p7, %p975_p3 }
  0x8e   : > { %683 = dma.done.wait (!%p468_p13), %s343_s17, 384  }
  0x8f   : > { %685 = vsyncadd (!%p468_p13), %s343_s17, 4294966912  ;;  %s21_s16 = sadd.s32 1, %s717_s16   ;;  %s977_s9 = smov %s693_s10 }
  0x90   : > { %p18_p4 = scmp.ge.s32.totalorder %s21_s16, 4   ;;  %s978_s10 = smov %s697_s11 }
  0x91   : > { %s979_s11 = smov %s800_s24  ;;  %s980_s12 = smov %s705_s13 }
  0x92   : > { %s951_s13 = smov 0   ;;  %s981_s14 = smov %s713_s15 }
  0x93   : > { %s982_s15 = smov %s984_s19  ;;  %20 = sbr.rel (!%p18_p4) target bundleno = 9 (0x9), region = 106 }
  0x9a   :  { %348 = vsyncpa [#allocation4], 1 }
  0x9b   :  { %350 = vsyncpa [#allocation4 + $0x1], 1 }
  0x9c   :  { %351 = vsyncpa [#allocation7], 1 }
  0x9d   :  { %353 = vsyncpa [#allocation7 + $0x1], 1 }
  0x9e   :  { %354 = vsyncpa [#allocation5], 1 }
  0x9f   :  { %356 = vsyncpa [#allocation5 + $0x1], 1 }

</bundles_post_ra>
